<compile_context>
chip_gen: v5e
topology: v5e:2x2
jax: 0.10.0
libtpu: 0.0.40
codegen_flags: <defaults>
</compile_context>

<pallas_src>
import functools

import jax
import jax.numpy as jnp
from jax.experimental import pallas as pl
from jax.experimental.pallas import tpu as pltpu


# ----------------------------- Fused Pallas kernel ---------------------------

def _qcritic_kernel(x_ref, a_ref, w_ref, b_ref, o_ref, *,
                    input_size, hidden_size, actions_nb,
                    hidden_layers_nb, output_size):
    """One grid step = one (TM, ·) batch tile; all weights are VMEM-resident.

    Packed weight blob slots (each zero-padded to (R_pad, C_pad)):
      0          : QCritic.fc_layer   W0   (input_size,  hidden)
      1          : FCNet input, h-part W_h (hidden,      hidden)   bias slot 1 = b_in
      2          : FCNet input, a-part W_a (actions_nb,  hidden)   bias slot 2 unused
      3..3+L-1   : FCNet hidden        W_l (hidden,      hidden)
      3+L        : FCNet output        W_o (hidden,      output_size)
    """

    def mm(act, slot, rows, cols):
        w = w_ref[slot][:rows, :cols]                        # bf16 value, static slice
        return jnp.dot(act.astype(jnp.bfloat16), w,
                       preferred_element_type=jnp.float32)   # MXU, f32 accumulate

    def bias(slot, cols):
        return b_ref[slot][:cols]                            # f32 (cols,)

    # fc_layer + relu
    h = jnp.maximum(mm(x_ref[...], 0, input_size, hidden_size)
                    + bias(0, hidden_size), 0.0)

    # FCNet input layer; torch.cat((h, a)) folded into a split matmul:
    #   relu([h, a] @ W_in + b_in) == relu(h @ W_h + a @ W_a + b_in)
    y = jnp.maximum(mm(h, 1, hidden_size, hidden_size)
                    + mm(a_ref[...], 2, actions_nb, hidden_size)
                    + bias(1, hidden_size), 0.0)

    # FCNet hidden layers (statically unrolled; L is small here).
    # TODO(synk): switch to lax.fori_loop(..., unroll=True) if hidden_layers_nb > ~8.
    for l in range(hidden_layers_nb):
        y = jnp.maximum(mm(y, 3 + l, hidden_size, hidden_size)
                        + bias(3 + l, hidden_size), 0.0)

    # FCNet output layer, no activation.
    o_ref[...] = (mm(y, 3 + hidden_layers_nb, hidden_size, output_size)
                  + bias(3 + hidden_layers_nb, output_size))


def make_qcritic_forward(input_size, hidden_size, actions_nb,
                         hidden_layers_nb, output_size, tm=128):
    """Returns a jitted forward(w_pack, b_pack, x, actions) -> (B, output_size)."""
    kernel = functools.partial(
        _qcritic_kernel,
        input_size=input_size, hidden_size=hidden_size, actions_nb=actions_nb,
        hidden_layers_nb=hidden_layers_nb, output_size=output_size)

    n_mats = 4 + hidden_layers_nb
    r_pad = max(input_size, hidden_size, actions_nb)
    c_pad = max(hidden_size, output_size)

    @jax.jit
    def forward(w_pack, b_pack, x, actions):
        b = x.shape[0]
        b_pad = max(pl.cdiv(b, tm), 1) * tm     # pad batch to a whole number of tiles
        x_p = jnp.zeros((b_pad, input_size), jnp.float32).at[:b].set(
            x.astype(jnp.float32))
        a_p = jnp.zeros((b_pad, actions_nb), jnp.float32).at[:b].set(
            actions.astype(jnp.float32))

        q = pl.pallas_call(
            kernel,
            out_shape=jax.ShapeDtypeStruct((b_pad, output_size), jnp.float32),
            grid=(b_pad // tm,),
            in_specs=[
                pl.BlockSpec((tm, input_size), lambda i: (i, 0)),
                pl.BlockSpec((tm, actions_nb), lambda i: (i, 0)),
                # Constant index_map -> weights/biases DMA'd once, stay VMEM-resident.
                pl.BlockSpec((n_mats, r_pad, c_pad), lambda i: (0, 0, 0)),
                pl.BlockSpec((n_mats, c_pad), lambda i: (0, 0)),
            ],
            out_specs=pl.BlockSpec((tm, output_size), lambda i: (i, 0)),
            compiler_params=pltpu.CompilerParams(
                dimension_semantics=("parallel",)),
        )(x_p, a_p, w_pack, b_pack)
        return q[:b]

    return forward


# ----------------------------- Parameter setup --------------------------------

def init_linear_params(key, in_features, out_features):
    """nn.Linear-style uniform(-1/sqrt(in), 1/sqrt(in)); weight = (in, out)."""
    kw, kb = jax.random.split(key)
    bound = 1.0 / jnp.sqrt(jnp.float32(in_features))
    w = jax.random.uniform(kw, (in_features, out_features), jnp.float32, -bound, bound)
    b = jax.random.uniform(kb, (out_features,), jnp.float32, -bound, bound)
    return w, b


def build_qcritic_params(key, input_size, hidden_size, actions_nb,
                         hidden_layers_nb, output_size):
    """Builds the two packed blobs consumed by the kernel."""
    n_mats = 4 + hidden_layers_nb
    r_pad = max(input_size, hidden_size, actions_nb)
    c_pad = max(hidden_size, output_size)

    keys = jax.random.split(key, 3 + hidden_layers_nb)
    w_pack = jnp.zeros((n_mats, r_pad, c_pad), jnp.float32)
    b_pack = jnp.zeros((n_mats, c_pad), jnp.float32)

    def put(wp, bp, slot, w, b=None):
        wp = wp.at[slot, :w.shape[0], :w.shape[1]].set(w)
        if b is not None:
            bp = bp.at[slot, :b.shape[0]].set(b)
        return wp, bp

    # QCritic.fc_layer : Linear(input_size, hidden_size)            -> slot 0
    w0, b0 = init_linear_params(keys[0], input_size, hidden_size)
    w_pack, b_pack = put(w_pack, b_pack, 0, w0, b0)

    # FCNet input layer : Linear(hidden_size + actions_nb, hidden_size),
    # pre-split so the kernel never materializes the concatenated activation.
    w_in, b_in = init_linear_params(keys[1], hidden_size + actions_nb, hidden_size)
    w_pack, b_pack = put(w_pack, b_pack, 1, w_in[:hidden_size], b_in)   # W_h + b_in
    w_pack, b_pack = put(w_pack, b_pack, 2, w_in[hidden_size:])         # W_a

    # FCNet hidden layers                                            -> slots 3..3+L-1
    for l in range(hidden_layers_nb):
        w, b = init_linear_params(keys[2 + l], hidden_size, hidden_size)
        w_pack, b_pack = put(w_pack, b_pack, 3 + l, w, b)

    # FCNet output layer : Linear(hidden_size, output_size)         -> slot 3+L
    wo, bo = init_linear_params(keys[2 + hidden_layers_nb], hidden_size, output_size)
    w_pack, b_pack = put(w_pack, b_pack, 3 + hidden_layers_nb, wo, bo)

    # bf16 weights feed the MXU natively; biases stay f32 (added on VPU in f32).
    return w_pack.astype(jnp.bfloat16), b_pack


# ----------------------------- Pure-JAX reference ------------------------------

def qcritic_reference(w_pack, b_pack, x, actions, *,
                      input_size, hidden_size, actions_nb,
                      hidden_layers_nb, output_size):
    """Torch-style forward (explicit concat) using the same bf16-weight rounding."""
    def mm(act, slot, rows, cols):
        return jnp.dot(act.astype(jnp.bfloat16), w_pack[slot, :rows, :cols],
                       preferred_element_type=jnp.float32)

    h = jnp.maximum(mm(x, 0, input_size, hidden_size) + b_pack[0, :hidden_size], 0.0)
    # torch.cat((h, actions)) then one Linear over the concatenated features.
    z = jnp.concatenate([h, actions.astype(jnp.float32)], axis=-1)
    w_in = jnp.concatenate([w_pack[1, :hidden_size, :hidden_size],
                            w_pack[2, :actions_nb, :hidden_size]], axis=0)
    y = jnp.maximum(jnp.dot(z.astype(jnp.bfloat16), w_in,
                            preferred_element_type=jnp.float32)
                    + b_pack[1, :hidden_size], 0.0)
    for l in range(hidden_layers_nb):
        y = jnp.maximum(mm(y, 3 + l, hidden_size, hidden_size)
                        + b_pack[3 + l, :hidden_size], 0.0)
    return (mm(y, 3 + hidden_layers_nb, hidden_size, output_size)
            + b_pack[3 + hidden_layers_nb, :output_size])


# ----------------------------- Main --------------------------------------------

if __name__ == "__main__":
    input_size = 16
    hidden_size = 32
    actions_nb = 4
    hidden_layers_nb = 2
    output_size = 1
    batch = 200            # padded to 256 inside the wrapper -> grid of 2 x 128-row tiles

    key = jax.random.PRNGKey(0)
    kp, kx, ka = jax.random.split(key, 3)

    w_pack, b_pack = build_qcritic_params(kp, input_size, hidden_size, actions_nb,
                                          hidden_layers_nb, output_size)

    x = jax.random.normal(kx, (batch, input_size), jnp.float32)
    actions = jax.random.normal(ka, (batch, actions_nb), jnp.float32)

    forward = make_qcritic_forward(input_size, hidden_size, actions_nb,
                                   hidden_layers_nb, output_size, tm=128)

    q = forward(w_pack, b_pack, x, actions)
    jax.block_until_ready(q)

    q_ref = qcritic_reference(w_pack, b_pack, x, actions,
                              input_size=input_size, hidden_size=hidden_size,
                              actions_nb=actions_nb,
                              hidden_layers_nb=hidden_layers_nb,
                              output_size=output_size)

    assert q.shape == (batch, output_size)
    assert jnp.allclose(q, q_ref, rtol=1e-3, atol=1e-3), (q[:4], q_ref[:4])

    print("KERNEL_OK")
</pallas_src>

<mosaic_0001>
module attributes {stable_mosaic.version = 11 : i64} {
  func.func @_qcritic_kernel(%arg0: i32, %arg1: memref<128x16xf32, #tpu.memory_space<vmem>>, %arg2: memref<128x4xf32, #tpu.memory_space<vmem>>, %arg3: memref<6x32x32xbf16, #tpu.memory_space<vmem>>, %arg4: memref<6x32xf32, #tpu.memory_space<vmem>>, %arg5: memref<128x1xf32, #tpu.memory_space<vmem>>) attributes {dimension_semantics = [#tpu.dimension_semantics<parallel>], iteration_bounds = array<i64: 2>, scalar_prefetch = 0 : i64, scratch_operands = 0 : i64, tpu.core_type = #tpu.core_type<tc>, window_params = [{transform_indices = @transform_0, window_bounds = array<i64: 128, 16>}, {transform_indices = @transform_1, window_bounds = array<i64: 128, 4>}, {pipeline_mode = #tpu.pipeline_mode<synchronous>, transform_indices = @transform_2, window_bounds = array<i64: 6, 32, 32>}, {pipeline_mode = #tpu.pipeline_mode<synchronous>, transform_indices = @transform_3, window_bounds = array<i64: 6, 32>}, {transform_indices = @transform_4, window_bounds = array<i64: 128, 1>}]} {
    %c0 = arith.constant 0 : index
    %c0_0 = arith.constant 0 : index
    %0 = vector.load %arg1[%c0, %c0_0] : memref<128x16xf32, #tpu.memory_space<vmem>>, vector<128x16xf32>
    %c0_1 = arith.constant 0 : index
    %c0_2 = arith.constant 0 : index
    %c0_3 = arith.constant 0 : index
    %1 = vector.load %arg3[%c0_1, %c0_2, %c0_3] : memref<6x32x32xbf16, #tpu.memory_space<vmem>>, vector<1x32x32xbf16>
    %2 = vector.shape_cast %1 : vector<1x32x32xbf16> to vector<32x32xbf16>
    %3 = vector.extract_strided_slice %2 {offsets = [0, 0], sizes = [16, 32], strides = [1, 1]} : vector<32x32xbf16> to vector<16x32xbf16>
    %4 = arith.truncf %0 : vector<128x16xf32> to vector<128x16xbf16>
    %cst = arith.constant dense<0.000000e+00> : vector<128x32xf32>
    %5 = tpu.matmul %4, %3, %cst {dimension_numbers = #tpu.dot_dimension_numbers<[1], [0], [0], [1], [0, 0, 1, 1], [], []>} : vector<128x16xbf16>, vector<16x32xbf16>, vector<128x32xf32> -> vector<128x32xf32>
    %c0_4 = arith.constant 0 : index
    %c0_5 = arith.constant 0 : index
    %6 = vector.load %arg4[%c0_4, %c0_5] : memref<6x32xf32, #tpu.memory_space<vmem>>, vector<1x32xf32>
    %7 = vector.shape_cast %6 : vector<1x32xf32> to vector<32xf32>
    %8 = vector.shape_cast %7 : vector<32xf32> to vector<1x32xf32>
    %9 = vector.broadcast %8 : vector<1x32xf32> to vector<128x32xf32>
    %10 = arith.addf %5, %9 : vector<128x32xf32>
    %cst_6 = arith.constant 0.000000e+00 : f32
    %11 = vector.broadcast %cst_6 : f32 to vector<128x32xf32>
    %12 = arith.maximumf %10, %11 : vector<128x32xf32>
    %c1 = arith.constant 1 : index
    %c0_7 = arith.constant 0 : index
    %c0_8 = arith.constant 0 : index
    %13 = vector.load %arg3[%c1, %c0_7, %c0_8] : memref<6x32x32xbf16, #tpu.memory_space<vmem>>, vector<1x32x32xbf16>
    %14 = vector.shape_cast %13 : vector<1x32x32xbf16> to vector<32x32xbf16>
    %15 = arith.truncf %12 : vector<128x32xf32> to vector<128x32xbf16>
    %cst_9 = arith.constant dense<0.000000e+00> : vector<128x32xf32>
    %16 = tpu.matmul %15, %14, %cst_9 {dimension_numbers = #tpu.dot_dimension_numbers<[1], [0], [0], [1], [0, 0, 1, 1], [], []>} : vector<128x32xbf16>, vector<32x32xbf16>, vector<128x32xf32> -> vector<128x32xf32>
    %c0_10 = arith.constant 0 : index
    %c0_11 = arith.constant 0 : index
    %17 = vector.load %arg2[%c0_10, %c0_11] : memref<128x4xf32, #tpu.memory_space<vmem>>, vector<128x4xf32>
    %c2 = arith.constant 2 : index
    %c0_12 = arith.constant 0 : index
    %c0_13 = arith.constant 0 : index
    %18 = vector.load %arg3[%c2, %c0_12, %c0_13] : memref<6x32x32xbf16, #tpu.memory_space<vmem>>, vector<1x32x32xbf16>
    %19 = vector.shape_cast %18 : vector<1x32x32xbf16> to vector<32x32xbf16>
    %20 = vector.extract_strided_slice %19 {offsets = [0, 0], sizes = [4, 32], strides = [1, 1]} : vector<32x32xbf16> to vector<4x32xbf16>
    %21 = arith.truncf %17 : vector<128x4xf32> to vector<128x4xbf16>
    %cst_14 = arith.constant dense<0.000000e+00> : vector<128x32xf32>
    %22 = tpu.matmul %21, %20, %cst_14 {dimension_numbers = #tpu.dot_dimension_numbers<[1], [0], [0], [1], [0, 0, 1, 1], [], []>} : vector<128x4xbf16>, vector<4x32xbf16>, vector<128x32xf32> -> vector<128x32xf32>
    %23 = arith.addf %16, %22 : vector<128x32xf32>
    %c1_15 = arith.constant 1 : index
    %c0_16 = arith.constant 0 : index
    %24 = vector.load %arg4[%c1_15, %c0_16] : memref<6x32xf32, #tpu.memory_space<vmem>>, vector<1x32xf32>
    %25 = vector.shape_cast %24 : vector<1x32xf32> to vector<32xf32>
    %26 = vector.shape_cast %25 : vector<32xf32> to vector<1x32xf32>
    %27 = vector.broadcast %26 : vector<1x32xf32> to vector<128x32xf32>
    %28 = arith.addf %23, %27 : vector<128x32xf32>
    %cst_17 = arith.constant 0.000000e+00 : f32
    %29 = vector.broadcast %cst_17 : f32 to vector<128x32xf32>
    %30 = arith.maximumf %28, %29 : vector<128x32xf32>
    %c3 = arith.constant 3 : index
    %c0_18 = arith.constant 0 : index
    %c0_19 = arith.constant 0 : index
    %31 = vector.load %arg3[%c3, %c0_18, %c0_19] : memref<6x32x32xbf16, #tpu.memory_space<vmem>>, vector<1x32x32xbf16>
    %32 = vector.shape_cast %31 : vector<1x32x32xbf16> to vector<32x32xbf16>
    %33 = arith.truncf %30 : vector<128x32xf32> to vector<128x32xbf16>
    %cst_20 = arith.constant dense<0.000000e+00> : vector<128x32xf32>
    %34 = tpu.matmul %33, %32, %cst_20 {dimension_numbers = #tpu.dot_dimension_numbers<[1], [0], [0], [1], [0, 0, 1, 1], [], []>} : vector<128x32xbf16>, vector<32x32xbf16>, vector<128x32xf32> -> vector<128x32xf32>
    %c3_21 = arith.constant 3 : index
    %c0_22 = arith.constant 0 : index
    %35 = vector.load %arg4[%c3_21, %c0_22] : memref<6x32xf32, #tpu.memory_space<vmem>>, vector<1x32xf32>
    %36 = vector.shape_cast %35 : vector<1x32xf32> to vector<32xf32>
    %37 = vector.shape_cast %36 : vector<32xf32> to vector<1x32xf32>
    %38 = vector.broadcast %37 : vector<1x32xf32> to vector<128x32xf32>
    %39 = arith.addf %34, %38 : vector<128x32xf32>
    %cst_23 = arith.constant 0.000000e+00 : f32
    %40 = vector.broadcast %cst_23 : f32 to vector<128x32xf32>
    %41 = arith.maximumf %39, %40 : vector<128x32xf32>
    %c4 = arith.constant 4 : index
    %c0_24 = arith.constant 0 : index
    %c0_25 = arith.constant 0 : index
    %42 = vector.load %arg3[%c4, %c0_24, %c0_25] : memref<6x32x32xbf16, #tpu.memory_space<vmem>>, vector<1x32x32xbf16>
    %43 = vector.shape_cast %42 : vector<1x32x32xbf16> to vector<32x32xbf16>
    %44 = arith.truncf %41 : vector<128x32xf32> to vector<128x32xbf16>
    %cst_26 = arith.constant dense<0.000000e+00> : vector<128x32xf32>
    %45 = tpu.matmul %44, %43, %cst_26 {dimension_numbers = #tpu.dot_dimension_numbers<[1], [0], [0], [1], [0, 0, 1, 1], [], []>} : vector<128x32xbf16>, vector<32x32xbf16>, vector<128x32xf32> -> vector<128x32xf32>
    %c4_27 = arith.constant 4 : index
    %c0_28 = arith.constant 0 : index
    %46 = vector.load %arg4[%c4_27, %c0_28] : memref<6x32xf32, #tpu.memory_space<vmem>>, vector<1x32xf32>
    %47 = vector.shape_cast %46 : vector<1x32xf32> to vector<32xf32>
    %48 = vector.shape_cast %47 : vector<32xf32> to vector<1x32xf32>
    %49 = vector.broadcast %48 : vector<1x32xf32> to vector<128x32xf32>
    %50 = arith.addf %45, %49 : vector<128x32xf32>
    %cst_29 = arith.constant 0.000000e+00 : f32
    %51 = vector.broadcast %cst_29 : f32 to vector<128x32xf32>
    %52 = arith.maximumf %50, %51 : vector<128x32xf32>
    %c5 = arith.constant 5 : index
    %c0_30 = arith.constant 0 : index
    %c0_31 = arith.constant 0 : index
    %53 = vector.load %arg3[%c5, %c0_30, %c0_31] : memref<6x32x32xbf16, #tpu.memory_space<vmem>>, vector<1x32x32xbf16>
    %54 = vector.shape_cast %53 : vector<1x32x32xbf16> to vector<32x32xbf16>
    %55 = vector.extract_strided_slice %54 {offsets = [0, 0], sizes = [32, 1], strides = [1, 1]} : vector<32x32xbf16> to vector<32x1xbf16>
    %56 = arith.truncf %52 : vector<128x32xf32> to vector<128x32xbf16>
    %cst_32 = arith.constant dense<0.000000e+00> : vector<128x1xf32>
    %57 = tpu.matmul %56, %55, %cst_32 {dimension_numbers = #tpu.dot_dimension_numbers<[1], [0], [0], [1], [0, 0, 1, 1], [], []>} : vector<128x32xbf16>, vector<32x1xbf16>, vector<128x1xf32> -> vector<128x1xf32>
    %c5_33 = arith.constant 5 : index
    %c0_34 = arith.constant 0 : index
    %58 = vector.load %arg4[%c5_33, %c0_34] : memref<6x32xf32, #tpu.memory_space<vmem>>, vector<1x32xf32>
    %59 = vector.shape_cast %58 : vector<1x32xf32> to vector<32xf32>
    %60 = vector.extract_strided_slice %59 {offsets = [0], sizes = [1], strides = [1]} : vector<32xf32> to vector<1xf32>
    %61 = vector.shape_cast %60 : vector<1xf32> to vector<1x1xf32>
    %62 = vector.broadcast %61 : vector<1x1xf32> to vector<128x1xf32>
    %63 = arith.addf %57, %62 : vector<128x1xf32>
    %c0_35 = arith.constant 0 : index
    %c0_36 = arith.constant 0 : index
    %64 = vector.load %arg5[%c0_35, %c0_36] : memref<128x1xf32, #tpu.memory_space<vmem>>, vector<128x1xf32>
    tpu.vector_store %arg5[%c0_35, %c0_36], %63 {strides = array<i32>} : memref<128x1xf32, #tpu.memory_space<vmem>>, vector<128x1xf32>,
    return
  }
  func.func @transform_0(%arg0: i32) -> (i32, i32) {
    %c0_i32 = arith.constant 0 : i32
    %c0_i32_0 = arith.constant 0 : i32
    return %arg0, %c0_i32 : i32, i32
  }
  func.func @transform_1(%arg0: i32) -> (i32, i32) {
    %c0_i32 = arith.constant 0 : i32
    %c0_i32_0 = arith.constant 0 : i32
    return %arg0, %c0_i32 : i32, i32
  }
  func.func @transform_2(%arg0: i32) -> (i32, i32, i32) {
    %c0_i32 = arith.constant 0 : i32
    %c0_i32_0 = arith.constant 0 : i32
    %c0_i32_1 = arith.constant 0 : i32
    %c0_i32_2 = arith.constant 0 : i32
    return %c0_i32, %c0_i32_0, %c0_i32_1 : i32, i32, i32
  }
  func.func @transform_3(%arg0: i32) -> (i32, i32) {
    %c0_i32 = arith.constant 0 : i32
    %c0_i32_0 = arith.constant 0 : i32
    %c0_i32_1 = arith.constant 0 : i32
    return %c0_i32, %c0_i32_0 : i32, i32
  }
  func.func @transform_4(%arg0: i32) -> (i32, i32) {
    %c0_i32 = arith.constant 0 : i32
    %c0_i32_0 = arith.constant 0 : i32
    return %arg0, %c0_i32 : i32, i32
  }
}

</mosaic_0001>

<bundles_post_ra>
// kernel: forward.1
= control target key start
LH: loop header
LB: loop body
LE: loop exit
PB: predicated region body
PF: predicated region fallthrough
CT: control target
= control target key end

     0   :  { %s1173_s15 = smov 0   ;;  %s1415_s0 = inlined_call_operand.vmem [shape: f32[256,16], index: 0, kind: input, shape index: {}]   ;;  %s1416_s1 = inlined_call_operand.vmem [shape: f32[256,4], index: 1, kind: input, shape index: {}]   ;;  %s1417_s2 = inlined_call_operand.vmem [shape: bf16[6,32,32], index: 2, kind: input, shape index: {}]   ;;  %s1418_s3 = inlined_call_operand.vmem [shape: f32[6,32], index: 3, kind: input, shape index: {}]   ;;  %s1419_s4 = inlined_call_operand.vmem [shape: f32[256,1], index: 4, kind: output, shape index: {}]  }
   0x1 LB: > { %s1002_s16 = sadd.s32 4294967295, %s1146_s15   ;;  %p1006_p0 = scmp.ge.s32.totalorder %s1146_s15, 1  ;;  %s1146_s15 = sphi %s1173_s15, %s14_s15  }
   0x2   : > { %p174_p1 = scmp.lt.s32.totalorder %s1146_s15, 3 }
   0x4   : > { %p175_p2 = pnand %p1006_p0, %p174_p1 }
   0x5   : > { %s1007_s19 = sshll.u32 (!%p175_p2), %s1002_s16, 4 }
   0x6   : > { %178 = sbr.rel (%p175_p2) target bundleno = 840 (0x348), region = 36  ;;  %p206_p3 = scmp.lt.s32.totalorder (!%p175_p2), %s1007_s19, 31 }
   0xb   : > { %v1116_v0 = vld [vmem:[%s1417_s2] sm:$0xff]  ;;  %s1421_s19 = smov (!%p206_p3, %s1007_s19), 31  ;;  %vm258_vm0 = vcmask 130048   ;;  %v1118_v10 = vld [vmem:[%s1417_s2 + $0x18] sm:$0xff]  ;;  %v1117_v17 = vld [vmem:[%s1417_s2 + $0x10] sm:$0xff]  ;;  %vm412_vm1 = vcmask 1041408  }
   0xc   : > { %290 = vmatpush.bf16.msra.mxu0 %v1116_v0  ;;  %1125 = vmatpush.bf16.msra.mxu2 %v1116_v0  ;;  %s1184_s20 = sshll.u32 %s1421_s19, 3  ;;  %v1029_v27 = vld [vmem:[%s1417_s2 + $0x20] sm:$0xf]  ;;  %vm387_vm2 = vcmask 31744   ;;  %vm477_vm3 = vcmask 261120   ;;  %vm917_vm4 = vcmask 7168  }
   0xd   : > { %s1190_s23 = scalar_lea.vmem %s1415_s0, %s1184_s20  ;;  %s1226_s30 = scalar_lea.vmem %s1416_s1, %s1184_s20  ;;  %v414_v28 = vsel %vm412_vm1, %v1029_v27, 0  ;;  %v1240_v36 = vld [vmem:[%s1418_s3] ss:$0 sm:$0xff] }
   0xe   : > { %v224_v1 = vld [vmem:[%s1190_s23] sm:$0xff]  ;;  %v225_v2 = vld [vmem:[%s1190_s23 + $0x8] sm:$0xff]  ;;  %v226_v4 = vld [vmem:[%s1190_s23 + $0x10] sm:$0xff]  ;;  %423 = vmatpush.bf16.msra.mxu1 %v414_v28  ;;  %1126 = vmatpush.bf16.msra.mxu3 %v414_v28  ;;  %s1378_s7 = scalar_lea.vmem %s1419_s4, %s1184_s20 }
   0xf   : > { %v242_v3 = vpack.c.bf16 %v225_v2, %v224_v1  ;;  %v227_v5 = vld [vmem:[%s1190_s23 + $0x18] sm:$0xff]  ;;  %v232_v7 = vld [vmem:[%s1190_s23 + $0x40] sm:$0xff]  ;;  %v233_v8 = vld [vmem:[%s1190_s23 + $0x48] sm:$0xff] }
  0x10   : > { %v243_v6 = vpack.c.bf16 %v227_v5, %v226_v4  ;;  %v246_v9 = vpack.c.bf16 %v233_v8, %v232_v7  ;;  %508 = vmatpush.bf16.msrb.mxu2 %v1118_v10  ;;  %v228_v11 = vld [vmem:[%s1190_s23 + $0x20] sm:$0xff]  ;;  %v229_v12 = vld [vmem:[%s1190_s23 + $0x28] sm:$0xff]  ;;  %v234_v13 = vld [vmem:[%s1190_s23 + $0x50] sm:$0xff] }
  0x11   : > { %1017 = vmatmul.msk.bf16.vlgmr.msra.gmra.mxu0 %vm258_vm0, %v242_v3  ;;  %v235_v14 = vld [vmem:[%s1190_s23 + $0x58] sm:$0xff]  ;;  %v244_v15 = vpack.c.bf16 %v229_v12, %v228_v11  ;;  %v230_v18 = vld [vmem:[%s1190_s23 + $0x30] sm:$0xff]  ;;  %v236_v20 = vld [vmem:[%s1190_s23 + $0x60] sm:$0xff] }
  0x12   : > { %1021 = vmatmul.msk.bf16.vlgmr.msra.gmra.mxu2 %vm258_vm0, %v246_v9  ;;  %v247_v16 = vpack.c.bf16 %v235_v14, %v234_v13  ;;  %v231_v19 = vld [vmem:[%s1190_s23 + $0x38] sm:$0xff]  ;;  %v237_v21 = vld [vmem:[%s1190_s23 + $0x68] sm:$0xff]  ;;  %v238_v24 = vld [vmem:[%s1190_s23 + $0x70] sm:$0xff] }
  0x13   : > { %v245_v22 = vpack.c.bf16 %v231_v19, %v230_v18  ;;  %v248_v23 = vpack.c.bf16 %v237_v21, %v236_v20  ;;  %v239_v25 = vld [vmem:[%s1190_s23 + $0x78] sm:$0xff]  ;;  %v361_v29 = vld [vmem:[%s1226_s30] sm:$0xff]  ;;  %v362_v30 = vld [vmem:[%s1226_s30 + $0x8] sm:$0xff] }
  0x14   : > { %509 = vmatpush.bf16.msrb.mxu2 %v1117_v17  ;;  %v249_v26 = vpack.c.bf16 %v239_v25, %v238_v24  ;;  %v379_v31 = vpack.c.bf16 %v362_v30, %v361_v29  ;;  %v363_v32 = vld [vmem:[%s1226_s30 + $0x10] sm:$0xff]  ;;  %v364_v33 = vld [vmem:[%s1226_s30 + $0x18] sm:$0xff]  ;;  %v365_v40 = vld [vmem:[%s1226_s30 + $0x20] sm:$0xff] }
  0x15   : > { %v380_v34 = vpack.c.bf16 %v364_v33, %v363_v32  ;;  %v366_v41 = vld [vmem:[%s1226_s30 + $0x28] sm:$0xff]  ;;  %v367_v50 = vld [vmem:[%s1226_s30 + $0x30] sm:$0xff]  ;;  %v368_v51 = vld [vmem:[%s1226_s30 + $0x38] sm:$0xff] }
  0x16   : > { %1030 = vmatmul.msk.bf16.vlgmr.msra.gmra.mxu1 %vm387_vm2, %v379_v31  ;;  %v381_v44 = vpack.c.bf16 %v366_v41, %v365_v40  ;;  %v382_v54 = vpack.c.bf16 %v368_v51, %v367_v50  ;;  %v369_v56 = vld [vmem:[%s1226_s30 + $0x40] sm:$0xff]  ;;  %v370_v57 = vld [vmem:[%s1226_s30 + $0x48] sm:$0xff]  ;;  %v371_v3 = vld [vmem:[%s1226_s30 + $0x50] sm:$0xff] }
  0x17   : > { %v383_v59 = vpack.c.bf16 %v370_v57, %v369_v56  ;;  %v372_v4 = vld [vmem:[%s1226_s30 + $0x58] sm:$0xff]  ;;  %v375_v25 = vld [vmem:[%s1226_s30 + $0x70] sm:$0xff] }
  0x18   : > { %v1120_v14 = vld [vmem:[%s1417_s2 + $0x38] sm:$0xff] }
  0x19   : > { %1034 = vmatmul.msk.bf16.vlgmr.msra.gmra.mxu3 %vm387_vm2, %v383_v59 }
  0x1a   : > { %642 = vmatpush.bf16.msrb.mxu3 %v1120_v14 }
  0x21   : > { %1018 = vmatmul.msk.bf16.gmra.mxu0 %vm258_vm0, %v243_v6  ;;  %v384_v6 = vpack.c.bf16 %v372_v4, %v371_v3 }
  0x22   : > { %1022 = vmatmul.msk.bf16.gmra.mxu2 %vm258_vm0, %v247_v16  ;;  %v374_v16 = vld [vmem:[%s1226_s30 + $0x68] sm:$0xff] }
  0x26   : > { %1031 = vmatmul.msk.bf16.gmra.mxu1 %vm387_vm2, %v380_v34 }
  0x29   : > { %1035 = vmatmul.msk.bf16.gmra.mxu3 %vm387_vm2, %v384_v6 }
  0x31   : > { %1019 = vmatmul.msk.bf16.gmra.mxu0 %vm258_vm0, %v244_v15  ;;  %v373_v15 = vld [vmem:[%s1226_s30 + $0x60] sm:$0xff] }
  0x32   : > { %1023 = vmatmul.msk.bf16.gmra.mxu2 %vm258_vm0, %v248_v23  ;;  %v385_v18 = vpack.c.bf16 %v374_v16, %v373_v15 }
  0x36   : > { %1032 = vmatmul.msk.bf16.gmra.mxu1 %vm387_vm2, %v381_v44 }
  0x39   : > { %1036 = vmatmul.msk.bf16.gmra.mxu3 %vm387_vm2, %v385_v18 }
  0x41   : > { %1020 = vmatmul.msk.bf16.gmra.mxu0 %vm258_vm0, %v245_v22 }
  0x42   : > { %1024 = vmatmul.msk.bf16.gmra.mxu2 %vm258_vm0, %v249_v26  ;;  %v376_v26 = vld [vmem:[%s1226_s30 + $0x78] sm:$0xff] }
  0x43   : > { %v386_v27 = vpack.c.bf16 %v376_v26, %v375_v25 }
  0x46   : > { %1033 = vmatmul.msk.bf16.gmra.mxu1 %vm387_vm2, %v382_v54 }
  0x49   : > { %1037 = vmatmul.msk.bf16.gmra.mxu3 %vm387_vm2, %v386_v27 }
  0x8e   : > { %v292_v35 = vpop.f32.mrf.mxu0 }
  0x8f   : > { %v293_v37 = vadd.f32 %v1240_v36, %v292_v35  ;;  %v1119_v35 = vld [vmem:[%s1417_s2 + $0x30] sm:$0xff] }
  0x90   : > { %643 = vmatpush.bf16.msrb.mxu3 %v1119_v35 }
  0x91   : > { %v332_v42 = vmax.f32 %v293_v37, 0.0 }
  0x95   : > { %v312_v1 = vpop.f32.mrf.mxu2 }
  0x96   : > { %v294_v38 = vpop.f32.mrf.mxu0  ;;  %v313_v19 = vadd.f32 %v1240_v36, %v312_v1 }
  0x97   : > { %v295_v39 = vadd.f32 %v1240_v36, %v294_v38 }
  0x98   : > { %v340_v21 = vmax.f32 %v313_v19, 0.0 }
  0x99   : > { %v333_v43 = vmax.f32 %v295_v39, 0.0 }
  0x9b   : > { %v353_v45 = vpack.c.bf16 %v333_v43, %v332_v42 }
  0x9d   : > { %1046 = vmatmul.msk.bf16.vlgmr.msrb.gmra.mxu2 %vm477_vm3, %v353_v45  ;;  %v314_v7 = vpop.f32.mrf.mxu2 }
  0x9e   : > { %v297_v46 = vpop.f32.mrf.mxu0  ;;  %v315_v20 = vadd.f32 %v1240_v36, %v314_v7 }
  0x9f   : > { %v298_v47 = vadd.f32 %v1240_v36, %v297_v46 }
  0xa0   : > { %v341_v22 = vmax.f32 %v315_v20, 0.0  ;;  %v445_v20 = vpop.f32.mrf.mxu3 }
  0xa1   : > { %v334_v52 = vmax.f32 %v298_v47, 0.0 }
  0xa2   : > { %v357_v24 = vpack.c.bf16 %v341_v22, %v340_v21 }
  0xa5   : > { %v317_v17 = vpop.f32.mrf.mxu2 }
  0xa6   : > { %v299_v48 = vpop.f32.mrf.mxu0  ;;  %v318_v29 = vadd.f32 %v1240_v36, %v317_v17 }
  0xa7   : > { %v300_v49 = vadd.f32 %v1240_v36, %v299_v48 }
  0xa8   : > { %v342_v31 = vmax.f32 %v318_v29, 0.0  ;;  %v447_v27 = vpop.f32.mrf.mxu3 }
  0xa9   : > { %v335_v53 = vmax.f32 %v300_v49, 0.0  ;;  %v425_v49 = vpop.f32.mrf.mxu1 }
  0xab   : > { %v354_v55 = vpack.c.bf16 %v335_v53, %v334_v52  ;;  %v1293_v53 = vld [vmem:[%s1418_s3 + $0x1] ss:$0 sm:$0xff] }
  0xad   : > { %1047 = vmatmul.msk.bf16.gmra.mxu2 %vm477_vm3, %v354_v55  ;;  %v319_v23 = vpop.f32.mrf.mxu2 }
  0xae   : > { %v302_v58 = vpop.f32.mrf.mxu0  ;;  %v320_v30 = vadd.f32 %v1240_v36, %v319_v23 }
  0xaf   : > { %v303_v60 = vadd.f32 %v1240_v36, %v302_v58 }
  0xb0   : > { %v343_v32 = vmax.f32 %v320_v30, 0.0 }
  0xb1   : > { %v336_v63 = vmax.f32 %v303_v60, 0.0  ;;  %v427_v50 = vpop.f32.mrf.mxu1 }
  0xb2   : > { %v358_v33 = vpack.c.bf16 %v343_v32, %v342_v31 }
  0xb5   : > { %v322_v28 = vpop.f32.mrf.mxu2 }
  0xb6   : > { %v304_v61 = vpop.f32.mrf.mxu0  ;;  %v323_v37 = vadd.f32 %v1240_v36, %v322_v28 }
  0xb7   : > { %v305_v62 = vadd.f32 %v1240_v36, %v304_v61 }
  0xb8   : > { %v344_v40 = vmax.f32 %v323_v37, 0.0 }
  0xb9   : > { %v337_v0 = vmax.f32 %v305_v62, 0.0  ;;  %v430_v54 = vpop.f32.mrf.mxu1 }
  0xbb   : > { %v355_v2 = vpack.c.bf16 %v337_v0, %v336_v63 }
  0xbd   : > { %1048 = vmatmul.msk.bf16.gmra.mxu2 %vm477_vm3, %v355_v2  ;;  %v324_v34 = vpop.f32.mrf.mxu2 }
  0xbe   : > { %v307_v5 = vpop.f32.mrf.mxu0  ;;  %v325_v38 = vadd.f32 %v1240_v36, %v324_v34  ;;  %v450_v34 = vpop.f32.mrf.mxu3 }
  0xbf   : > { %v308_v8 = vadd.f32 %v1240_v36, %v307_v5 }
  0xc0   : > { %v345_v41 = vmax.f32 %v325_v38, 0.0 }
  0xc1   : > { %v338_v11 = vmax.f32 %v308_v8, 0.0  ;;  %v432_v61 = vpop.f32.mrf.mxu1 }
  0xc2   : > { %v359_v42 = vpack.c.bf16 %v345_v41, %v344_v40 }
  0xc5   : > { %v327_v39 = vpop.f32.mrf.mxu2 }
  0xc6   : > { %v309_v9 = vpop.f32.mrf.mxu0  ;;  %v328_v44 = vadd.f32 %v1240_v36, %v327_v39 }
  0xc7   : > { %v310_v10 = vadd.f32 %v1240_v36, %v309_v9 }
  0xc8   : > { %v346_v46 = vmax.f32 %v328_v44, 0.0 }
  0xc9   : > { %v339_v12 = vmax.f32 %v310_v10, 0.0  ;;  %v435_v3 = vpop.f32.mrf.mxu1 }
  0xcb   : > { %v356_v13 = vpack.c.bf16 %v339_v12, %v338_v11 }
  0xcd   : > { %1049 = vmatmul.msk.bf16.gmra.mxu2 %vm477_vm3, %v356_v13  ;;  %v329_v43 = vpop.f32.mrf.mxu2 }
  0xce   : > { %v330_v45 = vadd.f32 %v1240_v36, %v329_v43  ;;  %v452_v43 = vpop.f32.mrf.mxu3 }
  0xd0   : > { %v347_v47 = vmax.f32 %v330_v45, 0.0 }
  0xd1   : > { %v437_v9 = vpop.f32.mrf.mxu1 }
  0xd2   : > { %v360_v48 = vpack.c.bf16 %v347_v47, %v346_v46 }
  0xd9   : > { %v440_v17 = vpop.f32.mrf.mxu1 }
  0xdd   : > { %1050 = vmatmul.msk.bf16.gmra.mxu2 %vm477_vm3, %v357_v24 }
  0xe1   : > { %v442_v22 = vpop.f32.mrf.mxu1 }
  0xed   : > { %1051 = vmatmul.msk.bf16.gmra.mxu2 %vm477_vm3, %v358_v33  ;;  %v1122_v33 = vld [vmem:[%s1417_s2 + $0x48] sm:$0xff] }
  0xee   : > { %758 = vmatpush.bf16.msrb.mxu0 %v1122_v33 }
  0xfd   : > { %1052 = vmatmul.msk.bf16.gmra.mxu2 %vm477_vm3, %v359_v42 }
 0x10d   : > { %1053 = vmatmul.msk.bf16.gmra.mxu2 %vm477_vm3, %v360_v48 }
 0x120   : > { %v511_v51 = vpop.f32.mrf.mxu2 }
 0x121   : > { %v512_v52 = vadd.f32 %v511_v51, %v425_v49  ;;  %v455_v49 = vpop.f32.mrf.mxu3 }
 0x123   : > { %v553_v56 = vadd.f32 %v1293_v53, %v512_v52 }
 0x125   : > { %v569_v58 = vmax.f32 %v553_v56, 0.0  ;;  %v1121_v56 = vld [vmem:[%s1417_s2 + $0x40] sm:$0xff] }
 0x126   : > { %759 = vmatpush.bf16.msrb.mxu0 %v1121_v56 }
 0x128   : > { %v513_v55 = vpop.f32.mrf.mxu2 }
 0x129   : > { %v514_v57 = vadd.f32 %v513_v55, %v427_v50 }
 0x12b   : > { %v554_v36 = vadd.f32 %v1293_v53, %v514_v57  ;;  %v457_v57 = vpop.f32.mrf.mxu3 }
 0x12d   : > { %v570_v59 = vmax.f32 %v554_v36, 0.0 }
 0x12f   : > { %v590_v60 = vpack.c.bf16 %v570_v59, %v569_v58 }
 0x130   : > { %v516_v62 = vpop.f32.mrf.mxu2 }
 0x131   : > { %1066 = vmatmul.msk.bf16.vlgmr.msrb.gmra.mxu3 %vm477_vm3, %v590_v60  ;;  %v517_v63 = vadd.f32 %v516_v62, %v430_v54 }
 0x133   : > { %v555_v1 = vadd.f32 %v1293_v53, %v517_v63 }
 0x135   : > { %v571_v5 = vmax.f32 %v555_v1, 0.0 }
 0x138   : > { %v518_v0 = vpop.f32.mrf.mxu2 }
 0x139   : > { %v519_v2 = vadd.f32 %v518_v0, %v432_v61  ;;  %v460_v0 = vpop.f32.mrf.mxu3 }
 0x13b   : > { %v556_v4 = vadd.f32 %v1293_v53, %v519_v2 }
 0x13d   : > { %v572_v6 = vmax.f32 %v556_v4, 0.0 }
 0x13f   : > { %v591_v7 = vpack.c.bf16 %v572_v6, %v571_v5 }
 0x140   : > { %v521_v8 = vpop.f32.mrf.mxu2 }
 0x141   : > { %1067 = vmatmul.msk.bf16.gmra.mxu3 %vm477_vm3, %v591_v7  ;;  %v522_v10 = vadd.f32 %v521_v8, %v435_v3  ;;  %v462_v4 = vpop.f32.mrf.mxu3 }
 0x143   : > { %v557_v12 = vadd.f32 %v1293_v53, %v522_v10 }
 0x145   : > { %v573_v15 = vmax.f32 %v557_v12, 0.0 }
 0x148   : > { %v523_v11 = vpop.f32.mrf.mxu2 }
 0x149   : > { %v524_v13 = vadd.f32 %v523_v11, %v437_v9 }
 0x14b   : > { %v558_v14 = vadd.f32 %v1293_v53, %v524_v13  ;;  %v1328_v13 = vld [vmem:[%s1418_s3 + $0x3] ss:$0 sm:$0xff] }
 0x14d   : > { %v574_v16 = vmax.f32 %v558_v14, 0.0 }
 0x14f   : > { %v592_v18 = vpack.c.bf16 %v574_v16, %v573_v15 }
 0x150   : > { %v526_v19 = vpop.f32.mrf.mxu2 }
 0x151   : > { %1068 = vmatmul.msk.bf16.gmra.mxu3 %vm477_vm3, %v592_v18  ;;  %v527_v21 = vadd.f32 %v526_v19, %v440_v17 }
 0x153   : > { %v559_v24 = vadd.f32 %v1293_v53, %v527_v21 }
 0x155   : > { %v575_v28 = vmax.f32 %v559_v24, 0.0 }
 0x158   : > { %v528_v23 = vpop.f32.mrf.mxu2 }
 0x159   : > { %v529_v25 = vadd.f32 %v528_v23, %v442_v22 }
 0x15b   : > { %v560_v26 = vadd.f32 %v1293_v53, %v529_v25 }
 0x15d   : > { %v576_v29 = vmax.f32 %v560_v26, 0.0 }
 0x15f   : > { %v593_v30 = vpack.c.bf16 %v576_v29, %v575_v28 }
 0x160   : > { %v531_v31 = vpop.f32.mrf.mxu2 }
 0x161   : > { %1069 = vmatmul.msk.bf16.gmra.mxu3 %vm477_vm3, %v593_v30  ;;  %v532_v32 = vadd.f32 %v531_v31, %v445_v20 }
 0x163   : > { %v561_v37 = vadd.f32 %v1293_v53, %v532_v32 }
 0x165   : > { %v577_v40 = vmax.f32 %v561_v37, 0.0 }
 0x168   : > { %v533_v35 = vpop.f32.mrf.mxu2 }
 0x169   : > { %v534_v38 = vadd.f32 %v533_v35, %v447_v27 }
 0x16b   : > { %v562_v39 = vadd.f32 %v1293_v53, %v534_v38 }
 0x16d   : > { %v578_v41 = vmax.f32 %v562_v39, 0.0 }
 0x16f   : > { %v594_v42 = vpack.c.bf16 %v578_v41, %v577_v40  ;;  %v1124_v41 = vld [vmem:[%s1417_s2 + $0x58] sm:$0xff] }
 0x170   : > { %v536_v44 = vpop.f32.mrf.mxu2  ;;  %874 = vmatpush.bf16.msrb.mxu1 %v1124_v41 }
 0x171   : > { %1070 = vmatmul.msk.bf16.gmra.mxu3 %vm477_vm3, %v594_v42  ;;  %v537_v45 = vadd.f32 %v536_v44, %v450_v34 }
 0x173   : > { %v563_v47 = vadd.f32 %v1293_v53, %v537_v45 }
 0x175   : > { %v579_v51 = vmax.f32 %v563_v47, 0.0 }
 0x178   : > { %v538_v46 = vpop.f32.mrf.mxu2 }
 0x179   : > { %v539_v48 = vadd.f32 %v538_v46, %v452_v43 }
 0x17b   : > { %v564_v50 = vadd.f32 %v1293_v53, %v539_v48 }
 0x17d   : > { %v580_v52 = vmax.f32 %v564_v50, 0.0 }
 0x17f   : > { %v595_v54 = vpack.c.bf16 %v580_v52, %v579_v51 }
 0x180   : > { %v541_v55 = vpop.f32.mrf.mxu2 }
 0x181   : > { %1071 = vmatmul.msk.bf16.gmra.mxu3 %vm477_vm3, %v595_v54  ;;  %v542_v36 = vadd.f32 %v541_v55, %v455_v49 }
 0x183   : > { %v565_v59 = vadd.f32 %v1293_v53, %v542_v36 }
 0x185   : > { %v581_v62 = vmax.f32 %v565_v59, 0.0 }
 0x188   : > { %v543_v58 = vpop.f32.mrf.mxu2 }
 0x189   : > { %v544_v60 = vadd.f32 %v543_v58, %v457_v57  ;;  %v1123_v57 = vld [vmem:[%s1417_s2 + $0x50] sm:$0xff] }
 0x18a   : > { %875 = vmatpush.bf16.msrb.mxu1 %v1123_v57 }
 0x18b   : > { %v566_v61 = vadd.f32 %v1293_v53, %v544_v60 }
 0x18d   : > { %v582_v63 = vmax.f32 %v566_v61, 0.0 }
 0x18f   : > { %v596_v1 = vpack.c.bf16 %v582_v63, %v581_v62 }
 0x190   : > { %v546_v2 = vpop.f32.mrf.mxu2 }
 0x191   : > { %1072 = vmatmul.msk.bf16.gmra.mxu3 %vm477_vm3, %v596_v1  ;;  %v547_v3 = vadd.f32 %v546_v2, %v460_v0 }
 0x193   : > { %v567_v6 = vadd.f32 %v1293_v53, %v547_v3 }
 0x195   : > { %v583_v9 = vmax.f32 %v567_v6, 0.0 }
 0x198   : > { %v548_v5 = vpop.f32.mrf.mxu2 }
 0x199   : > { %v549_v7 = vadd.f32 %v548_v5, %v462_v4 }
 0x19b   : > { %v568_v8 = vadd.f32 %v1293_v53, %v549_v7 }
 0x19d   : > { %v584_v10 = vmax.f32 %v568_v8, 0.0  ;;  %v1138_v8 = vld [vmem:[%s1418_s3 + $0x4] ss:$0 sm:$0xff] }
 0x19f   : > { %v597_v11 = vpack.c.bf16 %v584_v10, %v583_v9 }
 0x1a1   : > { %1073 = vmatmul.msk.bf16.gmra.mxu3 %vm477_vm3, %v597_v11 }
 0x1b4   : > { %v645_v12 = vpop.f32.mrf.mxu3 }
 0x1b5   : > { %v646_v14 = vadd.f32 %v1328_v13, %v645_v12 }
 0x1b7   : > { %v685_v17 = vmax.f32 %v646_v14, 0.0 }
 0x1bc   : > { %v647_v15 = vpop.f32.mrf.mxu3 }
 0x1bd   : > { %v648_v16 = vadd.f32 %v1328_v13, %v647_v15 }
 0x1bf   : > { %v686_v18 = vmax.f32 %v648_v16, 0.0 }
 0x1c1   : > { %v706_v19 = vpack.c.bf16 %v686_v18, %v685_v17 }
 0x1c3   : > { %1086 = vmatmul.msk.bf16.vlgmr.msrb.gmra.mxu0 %vm477_vm3, %v706_v19 }
 0x1c4   : > { %v650_v53 = vpop.f32.mrf.mxu3 }
 0x1c5   : > { %v651_v20 = vadd.f32 %v1328_v13, %v650_v53 }
 0x1c7   : > { %v687_v23 = vmax.f32 %v651_v20, 0.0 }
 0x1cc   : > { %v652_v21 = vpop.f32.mrf.mxu3 }
 0x1cd   : > { %v653_v22 = vadd.f32 %v1328_v13, %v652_v21 }
 0x1cf   : > { %v688_v24 = vmax.f32 %v653_v22, 0.0 }
 0x1d1   : > { %v707_v25 = vpack.c.bf16 %v688_v24, %v687_v23 }
 0x1d3   : > { %1087 = vmatmul.msk.bf16.gmra.mxu0 %vm477_vm3, %v707_v25 }
 0x1d4   : > { %v655_v26 = vpop.f32.mrf.mxu3 }
 0x1d5   : > { %v656_v27 = vadd.f32 %v1328_v13, %v655_v26 }
 0x1d7   : > { %v689_v30 = vmax.f32 %v656_v27, 0.0 }
 0x1dc   : > { %v657_v28 = vpop.f32.mrf.mxu3 }
 0x1dd   : > { %v658_v29 = vadd.f32 %v1328_v13, %v657_v28 }
 0x1df   : > { %v690_v31 = vmax.f32 %v658_v29, 0.0 }
 0x1e1   : > { %v708_v32 = vpack.c.bf16 %v690_v31, %v689_v30 }
 0x1e3   : > { %1088 = vmatmul.msk.bf16.gmra.mxu0 %vm477_vm3, %v708_v32 }
 0x1e4   : > { %v660_v33 = vpop.f32.mrf.mxu3 }
 0x1e5   : > { %v661_v34 = vadd.f32 %v1328_v13, %v660_v33 }
 0x1e7   : > { %v691_v38 = vmax.f32 %v661_v34, 0.0 }
 0x1ec   : > { %v662_v35 = vpop.f32.mrf.mxu3 }
 0x1ed   : > { %v663_v37 = vadd.f32 %v1328_v13, %v662_v35 }
 0x1ef   : > { %v692_v39 = vmax.f32 %v663_v37, 0.0 }
 0x1f1   : > { %v709_v40 = vpack.c.bf16 %v692_v39, %v691_v38 }
 0x1f3   : > { %1089 = vmatmul.msk.bf16.gmra.mxu0 %vm477_vm3, %v709_v40 }
 0x1f4   : > { %v665_v42 = vpop.f32.mrf.mxu3 }
 0x1f5   : > { %v666_v43 = vadd.f32 %v1328_v13, %v665_v42 }
 0x1f7   : > { %v693_v46 = vmax.f32 %v666_v43, 0.0 }
 0x1fc   : > { %v667_v44 = vpop.f32.mrf.mxu3 }
 0x1fd   : > { %v668_v45 = vadd.f32 %v1328_v13, %v667_v44 }
 0x1ff   : > { %v694_v47 = vmax.f32 %v668_v45, 0.0 }
 0x201   : > { %v710_v48 = vpack.c.bf16 %v694_v47, %v693_v46 }
 0x203   : > { %1090 = vmatmul.msk.bf16.gmra.mxu0 %vm477_vm3, %v710_v48 }
 0x204   : > { %v670_v49 = vpop.f32.mrf.mxu3 }
 0x205   : > { %v671_v50 = vadd.f32 %v1328_v13, %v670_v49 }
 0x207   : > { %v695_v54 = vmax.f32 %v671_v50, 0.0 }
 0x20c   : > { %v672_v51 = vpop.f32.mrf.mxu3 }
 0x20d   : > { %v673_v52 = vadd.f32 %v1328_v13, %v672_v51 }
 0x20f   : > { %v696_v55 = vmax.f32 %v673_v52, 0.0 }
 0x211   : > { %v711_v56 = vpack.c.bf16 %v696_v55, %v695_v54 }
 0x213   : > { %1091 = vmatmul.msk.bf16.gmra.mxu0 %vm477_vm3, %v711_v56 }
 0x214   : > { %v675_v36 = vpop.f32.mrf.mxu3 }
 0x215   : > { %v676_v58 = vadd.f32 %v1328_v13, %v675_v36 }
 0x217   : > { %v697_v61 = vmax.f32 %v676_v58, 0.0 }
 0x21c   : > { %v677_v59 = vpop.f32.mrf.mxu3 }
 0x21d   : > { %v678_v60 = vadd.f32 %v1328_v13, %v677_v59 }
 0x21f   : > { %v698_v62 = vmax.f32 %v678_v60, 0.0 }
 0x221   : > { %v712_v63 = vpack.c.bf16 %v698_v62, %v697_v61 }
 0x223   : > { %1092 = vmatmul.msk.bf16.gmra.mxu0 %vm477_vm3, %v712_v63 }
 0x224   : > { %v680_v0 = vpop.f32.mrf.mxu3 }
 0x225   : > { %v681_v1 = vadd.f32 %v1328_v13, %v680_v0  ;;  %v1139_v0 = vld [vmem:[%s1418_s3 + $0x5] ss:$0 sm:$0xff] }
 0x227   : > { %v699_v4 = vmax.f32 %v681_v1, 0.0 }
 0x22c   : > { %v682_v2 = vpop.f32.mrf.mxu3 }
 0x22d   : > { %v683_v3 = vadd.f32 %v1328_v13, %v682_v2 }
 0x22f   : > { %v700_v5 = vmax.f32 %v683_v3, 0.0 }
 0x231   : > { %v713_v6 = vpack.c.bf16 %v700_v5, %v699_v4 }
 0x233   : > { %1093 = vmatmul.msk.bf16.gmra.mxu0 %vm477_vm3, %v713_v6 }
 0x240   : > { %v761_v7 = vpop.f32.mrf.mxu0 }
 0x241   : > { %v762_v9 = vadd.f32 %v1138_v8, %v761_v7 }
 0x243   : > { %v801_v12 = vmax.f32 %v762_v9, 0.0 }
 0x248   : > { %v763_v10 = vpop.f32.mrf.mxu0 }
 0x249   : > { %v764_v11 = vadd.f32 %v1138_v8, %v763_v10 }
 0x24b   : > { %v802_v14 = vmax.f32 %v764_v11, 0.0 }
 0x24d   : > { %v822_v15 = vpack.c.bf16 %v802_v14, %v801_v12 }
 0x24f   : > { %1106 = vmatmul.msk.bf16.vlgmr.msrb.gmra.mxu1 %vm477_vm3, %v822_v15 }
 0x250   : > { %v766_v16 = vpop.f32.mrf.mxu0 }
 0x251   : > { %v767_v13 = vadd.f32 %v1138_v8, %v766_v16 }
 0x253   : > { %v803_v19 = vmax.f32 %v767_v13, 0.0 }
 0x258   : > { %v768_v17 = vpop.f32.mrf.mxu0 }
 0x259   : > { %v769_v18 = vadd.f32 %v1138_v8, %v768_v17 }
 0x25b   : > { %v804_v53 = vmax.f32 %v769_v18, 0.0 }
 0x25d   : > { %v823_v20 = vpack.c.bf16 %v804_v53, %v803_v19 }
 0x25f   : > { %1107 = vmatmul.msk.bf16.gmra.mxu1 %vm477_vm3, %v823_v20 }
 0x260   : > { %v771_v21 = vpop.f32.mrf.mxu0 }
 0x261   : > { %v772_v22 = vadd.f32 %v1138_v8, %v771_v21 }
 0x263   : > { %v805_v25 = vmax.f32 %v772_v22, 0.0 }
 0x268   : > { %v773_v23 = vpop.f32.mrf.mxu0 }
 0x269   : > { %v774_v24 = vadd.f32 %v1138_v8, %v773_v23 }
 0x26b   : > { %v806_v26 = vmax.f32 %v774_v24, 0.0 }
 0x26d   : > { %v824_v27 = vpack.c.bf16 %v806_v26, %v805_v25 }
 0x26f   : > { %1108 = vmatmul.msk.bf16.gmra.mxu1 %vm477_vm3, %v824_v27 }
 0x270   : > { %v776_v28 = vpop.f32.mrf.mxu0 }
 0x271   : > { %v777_v29 = vadd.f32 %v1138_v8, %v776_v28 }
 0x273   : > { %v807_v32 = vmax.f32 %v777_v29, 0.0 }
 0x278   : > { %v778_v30 = vpop.f32.mrf.mxu0 }
 0x279   : > { %v779_v31 = vadd.f32 %v1138_v8, %v778_v30 }
 0x27b   : > { %v808_v33 = vmax.f32 %v779_v31, 0.0 }
 0x27d   : > { %v825_v34 = vpack.c.bf16 %v808_v33, %v807_v32 }
 0x27f   : > { %1109 = vmatmul.msk.bf16.gmra.mxu1 %vm477_vm3, %v825_v34 }
 0x280   : > { %v781_v35 = vpop.f32.mrf.mxu0 }
 0x281   : > { %v782_v37 = vadd.f32 %v1138_v8, %v781_v35 }
 0x283   : > { %v809_v40 = vmax.f32 %v782_v37, 0.0 }
 0x288   : > { %v783_v38 = vpop.f32.mrf.mxu0 }
 0x289   : > { %v784_v39 = vadd.f32 %v1138_v8, %v783_v38 }
 0x28b   : > { %v810_v41 = vmax.f32 %v784_v39, 0.0 }
 0x28d   : > { %v826_v42 = vpack.c.bf16 %v810_v41, %v809_v40 }
 0x28f   : > { %1110 = vmatmul.msk.bf16.gmra.mxu1 %vm477_vm3, %v826_v42 }
 0x290   : > { %v786_v43 = vpop.f32.mrf.mxu0 }
 0x291   : > { %v787_v44 = vadd.f32 %v1138_v8, %v786_v43 }
 0x293   : > { %v811_v47 = vmax.f32 %v787_v44, 0.0 }
 0x298   : > { %v788_v45 = vpop.f32.mrf.mxu0 }
 0x299   : > { %v789_v46 = vadd.f32 %v1138_v8, %v788_v45 }
 0x29b   : > { %v812_v48 = vmax.f32 %v789_v46, 0.0 }
 0x29d   : > { %v827_v49 = vpack.c.bf16 %v812_v48, %v811_v47 }
 0x29f   : > { %1111 = vmatmul.msk.bf16.gmra.mxu1 %vm477_vm3, %v827_v49 }
 0x2a0   : > { %v791_v50 = vpop.f32.mrf.mxu0 }
 0x2a1   : > { %v792_v51 = vadd.f32 %v1138_v8, %v791_v50 }
 0x2a3   : > { %v813_v55 = vmax.f32 %v792_v51, 0.0 }
 0x2a8   : > { %v793_v52 = vpop.f32.mrf.mxu0 }
 0x2a9   : > { %v794_v54 = vadd.f32 %v1138_v8, %v793_v52 }
 0x2ab   : > { %v814_v56 = vmax.f32 %v794_v54, 0.0 }
 0x2ad   : > { %v828_v57 = vpack.c.bf16 %v814_v56, %v813_v55 }
 0x2af   : > { %1112 = vmatmul.msk.bf16.gmra.mxu1 %vm477_vm3, %v828_v57 }
 0x2b0   : > { %v796_v36 = vpop.f32.mrf.mxu0 }
 0x2b1   : > { %v797_v58 = vadd.f32 %v1138_v8, %v796_v36 }
 0x2b3   : > { %v815_v61 = vmax.f32 %v797_v58, 0.0 }
 0x2b8   : > { %v798_v59 = vpop.f32.mrf.mxu0 }
 0x2b9   : > { %v799_v60 = vadd.f32 %v1138_v8, %v798_v59 }
 0x2bb   : > { %v816_v62 = vmax.f32 %v799_v60, 0.0 }
 0x2bd   : > { %v829_v63 = vpack.c.bf16 %v816_v62, %v815_v61 }
 0x2bf   : > { %1113 = vmatmul.msk.bf16.gmra.mxu1 %vm477_vm3, %v829_v63 }
 0x2cc   : > { %v877_v1 = vpop.f32.mrf.mxu1 }
 0x2cd   : > { %v878_v2 = vadd.f32 %v1139_v0, %v877_v1 }
 0x2cf   : > { %918 = vst.msk [vmem:[%s1378_s7] sm:$0xff] %vm917_vm4, %v878_v2 }
 0x2d4   : > { %v879_v3 = vpop.f32.mrf.mxu1 }
 0x2d5   : > { %v880_v4 = vadd.f32 %v1139_v0, %v879_v3 }
 0x2d7   : > { %919 = vst.msk [vmem:[%s1378_s7 + $0x8] sm:$0xff] %vm917_vm4, %v880_v4 }
 0x2dc   : > { %v882_v5 = vpop.f32.mrf.mxu1 }
 0x2dd   : > { %v883_v6 = vadd.f32 %v1139_v0, %v882_v5 }
 0x2df   : > { %920 = vst.msk [vmem:[%s1378_s7 + $0x10] sm:$0xff] %vm917_vm4, %v883_v6 }
 0x2e4   : > { %v884_v7 = vpop.f32.mrf.mxu1 }
 0x2e5   : > { %v885_v8 = vadd.f32 %v1139_v0, %v884_v7 }
 0x2e7   : > { %921 = vst.msk [vmem:[%s1378_s7 + $0x18] sm:$0xff] %vm917_vm4, %v885_v8 }
 0x2ec   : > { %v887_v9 = vpop.f32.mrf.mxu1 }
 0x2ed   : > { %v888_v10 = vadd.f32 %v1139_v0, %v887_v9 }
 0x2ef   : > { %922 = vst.msk [vmem:[%s1378_s7 + $0x20] sm:$0xff] %vm917_vm4, %v888_v10 }
 0x2f4   : > { %v889_v11 = vpop.f32.mrf.mxu1 }
 0x2f5   : > { %v890_v12 = vadd.f32 %v1139_v0, %v889_v11 }
 0x2f7   : > { %923 = vst.msk [vmem:[%s1378_s7 + $0x28] sm:$0xff] %vm917_vm4, %v890_v12 }
 0x2fc   : > { %v892_v14 = vpop.f32.mrf.mxu1 }
 0x2fd   : > { %v893_v15 = vadd.f32 %v1139_v0, %v892_v14 }
 0x2ff   : > { %924 = vst.msk [vmem:[%s1378_s7 + $0x30] sm:$0xff] %vm917_vm4, %v893_v15 }
 0x304   : > { %v894_v16 = vpop.f32.mrf.mxu1 }
 0x305   : > { %v895_v13 = vadd.f32 %v1139_v0, %v894_v16 }
 0x307   : > { %925 = vst.msk [vmem:[%s1378_s7 + $0x38] sm:$0xff] %vm917_vm4, %v895_v13 }
 0x30c   : > { %v897_v17 = vpop.f32.mrf.mxu1 }
 0x30d   : > { %v898_v18 = vadd.f32 %v1139_v0, %v897_v17 }
 0x30f   : > { %926 = vst.msk [vmem:[%s1378_s7 + $0x40] sm:$0xff] %vm917_vm4, %v898_v18 }
 0x314   : > { %v899_v19 = vpop.f32.mrf.mxu1 }
 0x315   : > { %v900_v53 = vadd.f32 %v1139_v0, %v899_v19 }
 0x317   : > { %927 = vst.msk [vmem:[%s1378_s7 + $0x48] sm:$0xff] %vm917_vm4, %v900_v53 }
 0x31c   : > { %v902_v20 = vpop.f32.mrf.mxu1 }
 0x31d   : > { %v903_v21 = vadd.f32 %v1139_v0, %v902_v20 }
 0x31f   : > { %928 = vst.msk [vmem:[%s1378_s7 + $0x50] sm:$0xff] %vm917_vm4, %v903_v21 }
 0x324   : > { %v904_v22 = vpop.f32.mrf.mxu1 }
 0x325   : > { %v905_v23 = vadd.f32 %v1139_v0, %v904_v22 }
 0x327   : > { %929 = vst.msk [vmem:[%s1378_s7 + $0x58] sm:$0xff] %vm917_vm4, %v905_v23 }
 0x32c   : > { %v907_v24 = vpop.f32.mrf.mxu1 }
 0x32d   : > { %v908_v25 = vadd.f32 %v1139_v0, %v907_v24 }
 0x32f   : > { %930 = vst.msk [vmem:[%s1378_s7 + $0x60] sm:$0xff] %vm917_vm4, %v908_v25 }
 0x334   : > { %v909_v26 = vpop.f32.mrf.mxu1 }
 0x335   : > { %v910_v27 = vadd.f32 %v1139_v0, %v909_v26 }
 0x337   : > { %931 = vst.msk [vmem:[%s1378_s7 + $0x68] sm:$0xff] %vm917_vm4, %v910_v27 }
 0x33c   : > { %v912_v28 = vpop.f32.mrf.mxu1 }
 0x33d   : > { %v913_v29 = vadd.f32 %v1139_v0, %v912_v28 }
 0x33f   : > { %932 = vst.msk [vmem:[%s1378_s7 + $0x70] sm:$0xff] %vm917_vm4, %v913_v29 }
 0x344   : > { %v914_v30 = vpop.f32.mrf.mxu1 }
 0x345   : > { %v915_v31 = vadd.f32 %v1139_v0, %v914_v30 }
 0x347   : > { %933 = vst.msk [vmem:[%s1378_s7 + $0x78] sm:$0xff] %vm917_vm4, %v915_v31 }
 0x348 PF: > { %s14_s15 = sadd.s32 1, %s1146_s15  }
 0x349   : > { %p11_p4 = scmp.ge.s32.totalorder %s14_s15, 4  }
 0x34b   :  { %13 = sbr.rel (!%p11_p4) target bundleno = 1 (0x1), region = 74 }

</bundles_post_ra>
